<compile_context>
chip_gen: v7x
topology: tpu7x:2x2x1
jax: 0.10.0
libtpu: 0.0.40
codegen_flags: <defaults>
</compile_context>

<pallas_src>
import functools

import jax
import jax.numpy as jnp
from jax.experimental import pallas as pl
from jax.experimental.pallas import tpu as pltpu


def _se_kernel(x_ref, w1_ref, b1_ref, w2_ref, b2_ref, o_ref, *, inv_hw, channels_last):
    # channels_last=False: x_ref (Bt, C, HW);  channels_last=True: x_ref (Bt, HW, C).
    # w1_ref: (C, Cr)  b1_ref: (1, Cr)  w2_ref: (Cr, C)  b2_ref: (1, C)
    x = x_ref[...]                                              # native dtype, single touch

    # Squeeze: global average pool with the f32 widen fused into the reduction.
    red_axis = 1 if channels_last else 2
    s = jnp.sum(x, axis=red_axis, dtype=jnp.float32) * inv_hw   # (Bt, C) f32

    # Excitation MLP: Linear -> ReLU -> Linear -> Sigmoid (f32, tiny).
    h = jnp.dot(s, w1_ref[...], preferred_element_type=jnp.float32) + b1_ref[...]
    h = jnp.maximum(h, 0.0)                                     # (Bt, Cr)
    z = jnp.dot(h, w2_ref[...], preferred_element_type=jnp.float32) + b2_ref[...]
    g = pl.reciprocal(1.0 + jnp.exp(-z))                        # sigmoid; exp + rcp on EUP

    # Scale: broadcast per-(batch, channel) gate over spatial positions.
    gate = g.astype(x.dtype)
    gate = gate[:, None, :] if channels_last else gate[:, :, None]
    o_ref[...] = (x * gate).astype(o_ref.dtype)


def _usable_vmem_bytes():
    """Per-generation VMEM budget for this kernel: capacity minus headroom."""
    try:
        cap = int(pltpu.get_tpu_info().vmem_capacity_bytes)
    except Exception:  # conservative (v7x-sized) fallback if the query is unavailable
        cap = 64 << 20
    return cap - max(8 << 20, cap // 8)


def _choose_batch_tile(B, bytes_per_batch, per_buffer_budget):
    """Pick Bt | B: MiB-scale buffers, fits the VMEM budget, >= 2 grid steps."""
    if bytes_per_batch > per_buffer_budget:
        # TODO(synk): dispatch to the two-phase HW-tiled path (pool+MLP pass, then
        # scale pass) instead of refusing, for slabs that exceed one buffer.
        raise ValueError(
            "SELayer Pallas kernel: one batch element needs "
            f"{bytes_per_batch} bytes per pipeline buffer, but the usable VMEM "
            f"budget is {per_buffer_budget} bytes per buffer.")
    target = 6 << 20                                          # ~4-8 MiB sweet spot
    want = max(1, min(per_buffer_budget // bytes_per_batch,
                      max(1, target // bytes_per_batch)))
    if B >= 2:
        want = min(want, B // 2)                              # keep >= 2 grid steps
    want = max(1, min(want, B))
    divisors = [d for d in range(1, want + 1) if B % d == 0]
    even_steps = [d for d in divisors if (B // d) % 2 == 0]   # balance the 2 TCs on v7x
    return max(even_steps) if even_steps else max(divisors)


def _se_call(x3, w1f, b1f, w2f, b2f, *, channels_last):
    B = x3.shape[0]
    if channels_last:
        HW, C = x3.shape[1], x3.shape[2]
    else:
        C, HW = x3.shape[1], x3.shape[2]
    Cr = w1f.shape[1]
    dtype = x3.dtype
    itemsize = jnp.dtype(dtype).itemsize

    weight_bytes = 4 * (w1f.size + b1f.size + w2f.size + b2f.size)
    usable = _usable_vmem_bytes()
    # Double-buffered input + output blocks -> 4 buffers of Bt*C*HW bytes each.
    per_buffer_budget = max(0, (usable - weight_bytes - (2 << 20)) // 4)
    bytes_per_batch = C * HW * itemsize
    bt = _choose_batch_tile(B, bytes_per_batch, per_buffer_budget)

    block = (bt, HW, C) if channels_last else (bt, C, HW)
    vmem_needed = 4 * bt * bytes_per_batch + weight_bytes + (2 << 20)
    vmem_limit = int(min(max(vmem_needed, 16 << 20), usable))

    cost = pl.CostEstimate(
        flops=4 * B * C * Cr + 3 * B * C * HW,                # MLP + pool + rescale
        transcendentals=B * C,                                # sigmoid exp
        bytes_accessed=2 * B * C * HW * itemsize + weight_bytes,
    )

    kernel = functools.partial(_se_kernel, inv_hw=1.0 / HW, channels_last=channels_last)

    return pl.pallas_call(
        kernel,
        out_shape=jax.ShapeDtypeStruct(x3.shape, dtype),
        grid_spec=pltpu.PrefetchScalarGridSpec(
            num_scalar_prefetch=0,
            grid=(B // bt,),
            in_specs=[
                pl.BlockSpec(block, lambda i: (i, 0, 0)),     # x: Bt batches / step
                pl.BlockSpec((C, Cr), lambda i: (0, 0)),      # w1 resident
                pl.BlockSpec((1, Cr), lambda i: (0, 0)),      # b1 resident
                pl.BlockSpec((Cr, C), lambda i: (0, 0)),      # w2 resident
                pl.BlockSpec((1, C), lambda i: (0, 0)),       # b2 resident
            ],
            out_specs=pl.BlockSpec(block, lambda i: (i, 0, 0)),
        ),
        compiler_params=pltpu.CompilerParams(
            dimension_semantics=("parallel",),                # megacore on v7x
            vmem_limit_bytes=vmem_limit,
        ),
        cost_estimate=cost,
        # TODO(synk): on v5e with tiny blocks, pipeline_mode=pl.Buffered(3) on the
        # x in_spec can hide DMA issue latency; kept at default depth for portability.
    )(x3, w1f, b1f, w2f, b2f)


def _prep_weights(w1, b1, w2, b2):
    return (w1.astype(jnp.float32), b1.reshape(1, -1).astype(jnp.float32),
            w2.astype(jnp.float32), b2.reshape(1, -1).astype(jnp.float32))


def se_layer(x_nchw, w1, b1, w2, b2):
    """SE forward, NCHW input (matches the PyTorch module layout).

    x_nchw: (B, C, H, W) in its native dtype (f32 or bf16).
    Weights: w1 (C, Cr), b1 (Cr,), w2 (Cr, C), b2 (C,)  (Linear stored as (in, out)).
    """
    B, C, H, W = x_nchw.shape
    x3 = x_nchw.reshape(B, C, H * W)
    out = _se_call(x3, *_prep_weights(w1, b1, w2, b2), channels_last=False)
    return out.reshape(B, C, H, W)


def se_layer_nhwc(x_nhwc, w1, b1, w2, b2):
    """SE forward, channels-last input (B, H, W, C): lane-dense stores (C on lanes)."""
    B, H, W, C = x_nhwc.shape
    x3 = x_nhwc.reshape(B, H * W, C)
    out = _se_call(x3, *_prep_weights(w1, b1, w2, b2), channels_last=True)
    return out.reshape(B, H, W, C)


def se_layer_ref(x_nchw, w1, b1, w2, b2):
    """Pure-JAX reference matching the PyTorch forward (computed in f32)."""
    xf = x_nchw.astype(jnp.float32)
    s = jnp.mean(xf, axis=(2, 3))                             # (B, C)
    h = jnp.maximum(s @ w1 + b1, 0.0)                         # (B, Cr)
    g = jax.nn.sigmoid(h @ w2 + b2)                           # (B, C)
    return xf * g[:, :, None, None]


if __name__ == "__main__":
    key = jax.random.PRNGKey(0)
    kx, kw1, kb1, kw2, kb2 = jax.random.split(key, 5)

    B, C, H, W = 2, 16, 16, 16
    reduction = 8
    Cr = C // reduction  # 2

    x = jax.random.normal(kx, (B, C, H, W), dtype=jnp.float32)
    # Deterministic parameter init (Linear weights stored as (in, out)).
    w1 = jax.random.normal(kw1, (C, Cr), dtype=jnp.float32) * 0.1
    b1 = jax.random.normal(kb1, (Cr,), dtype=jnp.float32) * 0.1
    w2 = jax.random.normal(kw2, (Cr, C), dtype=jnp.float32) * 0.1
    b2 = jax.random.normal(kb2, (C,), dtype=jnp.float32) * 0.1

    ref = se_layer_ref(x, w1, b1, w2, b2)

    # NCHW float32 path (exact check).
    out = se_layer(x, w1, b1, w2, b2)
    jax.block_until_ready(out)
    assert out.shape == (B, C, H, W) and out.dtype == jnp.float32
    assert jnp.allclose(out, ref, atol=1e-5, rtol=1e-5), "NCHW f32 mismatch vs reference"

    # NCHW bfloat16 streaming path (looser tolerance).
    x_bf16 = x.astype(jnp.bfloat16)
    out_bf16 = se_layer(x_bf16, w1, b1, w2, b2)
    jax.block_until_ready(out_bf16)
    ref_bf16 = se_layer_ref(x_bf16, w1, b1, w2, b2)
    assert out_bf16.dtype == jnp.bfloat16
    assert jnp.allclose(out_bf16.astype(jnp.float32), ref_bf16, atol=5e-2, rtol=5e-2), \
        "NCHW bf16 mismatch vs reference"

    # Channels-last (lane-dense stores) path.
    x_nhwc = jnp.transpose(x, (0, 2, 3, 1))
    out_nhwc = se_layer_nhwc(x_nhwc, w1, b1, w2, b2)
    jax.block_until_ready(out_nhwc)
    assert jnp.allclose(jnp.transpose(out_nhwc, (0, 3, 1, 2)), ref, atol=1e-5, rtol=1e-5), \
        "NHWC mismatch vs reference"

    # Larger batch exercising the batch-tiled grid (Bt > 1).
    xb = jax.random.normal(kx, (8, C, H, W), dtype=jnp.float32)
    out_b = se_layer(xb, w1, b1, w2, b2)
    jax.block_until_ready(out_b)
    ref_b = se_layer_ref(xb, w1, b1, w2, b2)
    assert jnp.allclose(out_b, ref_b, atol=1e-5, rtol=1e-5), "batch-tiled mismatch vs reference"

    print("KERNEL_OK")
</pallas_src>

<mosaic_0001>
module attributes {stable_mosaic.version = 11 : i64} {
  func.func @_se_kernel(%arg0: i32, %arg1: memref<1x16x256xf32, #tpu.memory_space<vmem>>, %arg2: memref<16x2xf32, #tpu.memory_space<vmem>>, %arg3: memref<1x2xf32, #tpu.memory_space<vmem>>, %arg4: memref<2x16xf32, #tpu.memory_space<vmem>>, %arg5: memref<1x16xf32, #tpu.memory_space<vmem>>, %arg6: memref<1x16x256xf32, #tpu.memory_space<vmem>>) attributes {dimension_semantics = [#tpu.dimension_semantics<parallel>], iteration_bounds = array<i64: 2>, scalar_prefetch = 0 : i64, scratch_operands = 0 : i64, tpu.core_type = #tpu.core_type<tc>, window_params = [{transform_indices = @transform_0, window_bounds = array<i64: 1, 16, 256>}, {pipeline_mode = #tpu.pipeline_mode<synchronous>, transform_indices = @transform_1, window_bounds = array<i64: 16, 2>}, {pipeline_mode = #tpu.pipeline_mode<synchronous>, transform_indices = @transform_2, window_bounds = array<i64: 1, 2>}, {pipeline_mode = #tpu.pipeline_mode<synchronous>, transform_indices = @transform_3, window_bounds = array<i64: 2, 16>}, {pipeline_mode = #tpu.pipeline_mode<synchronous>, transform_indices = @transform_4, window_bounds = array<i64: 1, 16>}, {transform_indices = @transform_5, window_bounds = array<i64: 1, 16, 256>}]} {
    %c0 = arith.constant 0 : index
    %c0_0 = arith.constant 0 : index
    %c0_1 = arith.constant 0 : index
    %0 = vector.load %arg1[%c0, %c0_0, %c0_1] : memref<1x16x256xf32, #tpu.memory_space<vmem>>, vector<1x16x256xf32>
    %cst = arith.constant dense<0.000000e+00> : vector<1x16xf32>
    %1 = vector.multi_reduction <add>, %0, %cst [2] : vector<1x16x256xf32> to vector<1x16xf32>
    %cst_2 = arith.constant 3.906250e-03 : f32
    %2 = vector.broadcast %cst_2 : f32 to vector<1x16xf32>
    %3 = arith.mulf %1, %2 : vector<1x16xf32>
    %c0_3 = arith.constant 0 : index
    %c0_4 = arith.constant 0 : index
    %4 = vector.load %arg2[%c0_3, %c0_4] : memref<16x2xf32, #tpu.memory_space<vmem>>, vector<16x2xf32>
    %cst_5 = arith.constant dense<0.000000e+00> : vector<1x2xf32>
    %5 = tpu.matmul %3, %4, %cst_5 {dimension_numbers = #tpu.dot_dimension_numbers<[1], [0], [0], [1], [0, 0, 1, 1], [], []>} : vector<1x16xf32>, vector<16x2xf32>, vector<1x2xf32> -> vector<1x2xf32>
    %c0_6 = arith.constant 0 : index
    %c0_7 = arith.constant 0 : index
    %6 = vector.load %arg3[%c0_6, %c0_7] : memref<1x2xf32, #tpu.memory_space<vmem>>, vector<1x2xf32>
    %7 = arith.addf %5, %6 : vector<1x2xf32>
    %cst_8 = arith.constant 0.000000e+00 : f32
    %8 = vector.broadcast %cst_8 : f32 to vector<1x2xf32>
    %9 = arith.maximumf %7, %8 : vector<1x2xf32>
    %c0_9 = arith.constant 0 : index
    %c0_10 = arith.constant 0 : index
    %10 = vector.load %arg4[%c0_9, %c0_10] : memref<2x16xf32, #tpu.memory_space<vmem>>, vector<2x16xf32>
    %cst_11 = arith.constant dense<0.000000e+00> : vector<1x16xf32>
    %11 = tpu.matmul %9, %10, %cst_11 {dimension_numbers = #tpu.dot_dimension_numbers<[1], [0], [0], [1], [0, 0, 1, 1], [], []>} : vector<1x2xf32>, vector<2x16xf32>, vector<1x16xf32> -> vector<1x16xf32>
    %c0_12 = arith.constant 0 : index
    %c0_13 = arith.constant 0 : index
    %12 = vector.load %arg5[%c0_12, %c0_13] : memref<1x16xf32, #tpu.memory_space<vmem>>, vector<1x16xf32>
    %13 = arith.addf %11, %12 : vector<1x16xf32>
    %cst_14 = arith.constant 0.000000e+00 : f32
    %14 = vector.broadcast %cst_14 : f32 to vector<1x16xf32>
    %15 = arith.subf %14, %13 : vector<1x16xf32>
    %16 = math.exp %15 : vector<1x16xf32>
    %cst_15 = arith.constant 1.000000e+00 : f32
    %17 = vector.broadcast %cst_15 : f32 to vector<1x16xf32>
    %18 = arith.addf %17, %16 : vector<1x16xf32>
    %19 = tpu.reciprocal %18 : vector<1x16xf32> -> vector<1x16xf32>
    %20 = vector.shape_cast %19 : vector<1x16xf32> to vector<1x16x1xf32>
    %21 = vector.broadcast %20 : vector<1x16x1xf32> to vector<1x16x256xf32>
    %22 = arith.mulf %0, %21 : vector<1x16x256xf32>
    %c0_16 = arith.constant 0 : index
    %c0_17 = arith.constant 0 : index
    %c0_18 = arith.constant 0 : index
    %23 = vector.load %arg6[%c0_16, %c0_17, %c0_18] : memref<1x16x256xf32, #tpu.memory_space<vmem>>, vector<1x16x256xf32>
    tpu.vector_store %arg6[%c0_16, %c0_17, %c0_18], %22 {strides = array<i32>} : memref<1x16x256xf32, #tpu.memory_space<vmem>>, vector<1x16x256xf32>,
    return
  }
  func.func @transform_0(%arg0: i32) -> (i32, i32, i32) {
    %c0_i32 = arith.constant 0 : i32
    %c0_i32_0 = arith.constant 0 : i32
    %c0_i32_1 = arith.constant 0 : i32
    return %arg0, %c0_i32, %c0_i32_0 : i32, i32, i32
  }
  func.func @transform_1(%arg0: i32) -> (i32, i32) {
    %c0_i32 = arith.constant 0 : i32
    %c0_i32_0 = arith.constant 0 : i32
    %c0_i32_1 = arith.constant 0 : i32
    return %c0_i32, %c0_i32_0 : i32, i32
  }
  func.func @transform_2(%arg0: i32) -> (i32, i32) {
    %c0_i32 = arith.constant 0 : i32
    %c0_i32_0 = arith.constant 0 : i32
    %c0_i32_1 = arith.constant 0 : i32
    return %c0_i32, %c0_i32_0 : i32, i32
  }
  func.func @transform_3(%arg0: i32) -> (i32, i32) {
    %c0_i32 = arith.constant 0 : i32
    %c0_i32_0 = arith.constant 0 : i32
    %c0_i32_1 = arith.constant 0 : i32
    return %c0_i32, %c0_i32_0 : i32, i32
  }
  func.func @transform_4(%arg0: i32) -> (i32, i32) {
    %c0_i32 = arith.constant 0 : i32
    %c0_i32_0 = arith.constant 0 : i32
    %c0_i32_1 = arith.constant 0 : i32
    return %c0_i32, %c0_i32_0 : i32, i32
  }
  func.func @transform_5(%arg0: i32) -> (i32, i32, i32) {
    %c0_i32 = arith.constant 0 : i32
    %c0_i32_0 = arith.constant 0 : i32
    %c0_i32_1 = arith.constant 0 : i32
    return %arg0, %c0_i32, %c0_i32_0 : i32, i32, i32
  }
}

</mosaic_0001>

<bundles_post_ra>
// kernel: tpu_custom_call.1
= control target key start
LH: loop header
LB: loop body
LE: loop exit
PB: predicated region body
PF: predicated region fallthrough
CT: control target
= control target key end

     0   :  { %10 = vsyncpa [#allocation3], 0  ;;  %s968_s0 = inlined_call_operand.hbm [shape: f32[2,16,256], index: 0, kind: input, shape index: {}]   ;;  %s969_s1 = inlined_call_operand.vmem [shape: f32[16,2], index: 1, kind: input, shape index: {}]   ;;  %s970_s2 = inlined_call_operand.vmem [shape: f32[1,2], index: 2, kind: input, shape index: {}]   ;;  %s971_s3 = inlined_call_operand.vmem [shape: f32[2,16], index: 3, kind: input, shape index: {}]   ;;  %s972_s4 = inlined_call_operand.vmem [shape: f32[1,16], index: 4, kind: input, shape index: {}]   ;;  %s973_s5 = inlined_call_operand.hbm [shape: f32[2,16,256], index: 5, kind: output, shape index: {}]  }
   0x1   :  { %12 = vsyncpa [#allocation3 + $0x1], 0 }
   0x2   :  { %13 = vsyncpa [#allocation4], 0 }
   0x3   :  { %15 = vsyncpa [#allocation4 + $0x1], 0  ;;  %s771_s18 = smov 0   ;;  %s773_s19 = smov 0  }
   0x4   :  { %s775_s20 = smov 0   ;;  %s777_s21 = smov 0  }
   0x5 LB: > { %s792_s22 = sadd.s32 4294967295, %s730_s21   ;;  %s538_s23 = sadd.s32 4294967294, %s730_s21   ;;  %s730_s21 = sphi %s777_s21, %s986_s21   ;;  %s726_s20 = sphi %s775_s20, %s985_s20   ;;  %s722_s19 = sphi %s773_s19, %s984_s19   ;;  %s718_s18 = sphi %s771_s18, %s983_s18  }
   0x6   : > { %s796_s24 = sadd.s32 1, %s730_s21   ;;  %s28_s25 = sadd.s32 1, %s726_s20 }
   0x7   : > { %s25_s26 = ssub.s32 %s730_s21, %s796_s24  ;;  %p35_p0 = scmp.ne.s32.totalorder %s726_s20, %s722_s19 }
   0x8   : > { %p26_p1 = scmp.eq.s32.totalorder %s25_s26, 0  ;;  %p36_p2 = scmp.eq.s32.totalorder %s730_s21, 0 }
   0x9   : > { %p41_p3 = scmp.ne.s32.totalorder %s722_s19, %s718_s18  ;;  %p42_p4 = scmp.eq.s32.totalorder %s792_s22, 0 }
   0xa   : > { %s808_s27 = scalar_select %p26_p1, %s726_s20, %s28_s25  }
   0xb   : > { %p810_p5 = por %p36_p2, %p35_p0  ;;  %p814_p6 = por %p42_p4, %p41_p3 }
   0xc   : > { %p149_p7 = scmp.eq.s32.totalorder %s792_s22, 1  ;;  %p155_p8 = scmp.eq.s32.totalorder %s538_s23, 1 }
   0xd   : > { %p589_p10 = scmp.lt.s32.totalorder %s730_s21, 2  ;;  %s187_s7 = sand.u32 1, %s726_s20  }
   0xe   : > { %p821_p11 = por %p149_p7, %p35_p0  ;;  %p825_p12 = por %p155_p8, %p41_p3 }
   0xf   : > { %s555_s8 = sshll.u32 %s730_s21, 9  ;;  %s541_s9 = sshll.u32 %s187_s7, 5 }
  0x10   : > { %s977_s30 = scalar_select %p821_p11, 1, 0 }
  0x11   : > { %s978_s6 = scalar_select %p825_p12, 1, 0 }
  0x12   : > { %s834_s12 = scalar_lea.hbm %s968_s0, %s555_s8  ;;  %s191_s13 = scalar_lea.vmem [#allocation2], %s541_s9 }
  0x13   : > { %s198_s14 = sshll.u32 %s191_s13, 4  ;;  %p838_p13 = pnand %p589_p10, %p810_p5  ;;  %s842_s14 = int_to_ptr.vmem [resolvable:$true] %s198_s14 }
  0x14   : > { %s844_s16 = scalar_lea.sflag [#allocation3], %s187_s7  ;;  %s634_s17 = scalar_lea.hbm %s834_s12, 512 }
  0x15   : > { %p635_p0 = scmp.ne.s32.totalorder %s834_s12, %s634_s17  ;;  %p636_p1 = pneg %p838_p13 }
  0x16   : > { %s639_s26 = scalar_lea.hbm %s968_s0, 1024  ;;  %p640_p4 = scmp.lt.u32.totalorder %s834_s12, %s968_s0 }
  0x17   : > { %p637_p2 = pnand %p636_p1, %p635_p0  ;;  %p641_p5 = scmp.lt.u32.totalorder %s639_s26, %s634_s17 }
  0x18   : > { %p643_p8 = scmp.lt.u32.totalorder %s634_s17, %s834_s12 }
  0x19   : > { %p638_p3 = pneg %p637_p2  ;;  %p642_p7 = por %p641_p5, %p640_p4 }
  0x1b   : > { %p644_p10 = por %p643_p8, %p642_p7 }
  0x1d   : > { %p645_p9 = pnand %p644_p10, %p638_p3 }
  0x1f   : > { %648 = shalt.err (!%p645_p9)
}
  0x20   : > { %s649_s7 = scalar_lea.vmem %s842_s14, 512  ;;  %s732_s9 = smov [#allocation2]  }
  0x21   : > { %p650_p0 = scmp.ne.s32.totalorder %s842_s14, %s649_s7  ;;  %s654_s10 = sshll.u32 %s732_s9, 4  ;;  %s655_s10 = int_to_ptr.vmem [resolvable:$false] %s654_s10 }
  0x22   : > { %s656_s11 = scalar_lea.vmem %s655_s10, 1024  ;;  %p657_p11 = scmp.lt.s32.totalorder %s842_s14, %s655_s10 }
  0x23   : > { %p652_p2 = pnand %p650_p0, %p636_p1  ;;  %p658_p4 = scmp.lt.s32.totalorder %s656_s11, %s649_s7 }
  0x25   : > { %p653_p12 = pneg %p652_p2  ;;  %p659_p5 = por %p658_p4, %p657_p11 }
  0x27   : > { %p660_p7 = pnand %p659_p5, %p653_p12 }
  0x29   : > { %663 = shalt.err (!%p660_p7)
}
  0x2a   : > { %s733_s13 = smov 256   ;;  %s734_s17 = smov 16  }
  0x2b   : > { %584 = dma.hbm_to_vmem [thread:$0]  (!%p838_p13), %s834_s12, 512, %s842_s14, %s844_s16, %s733_s13, %s733_s13, %s734_s17  }
  0x2c   : > { %p544_p9 = scmp.ge.s32.totalorder %s730_s21, 1  ;;  %p206_p1 = scmp.lt.s32.totalorder %s730_s21, 3 }
  0x2e   : > { %p207_p3 = pnand %p544_p9, %p206_p1 }
  0x2f   : > { %s875_s23 = sand.u32 (!%p207_p3), 1, %s722_s19  }
  0x30   : > { %210 = sbr.rel (%p207_p3) target bundleno = 806 (0x326), region = 40  ;;  %s545_s25 = sshll.u32 (!%p207_p3), %s875_s23, 5 }
  0x31   : > { %s213_s26 = scalar_lea.sflag (!%p207_p3), [#allocation3], %s875_s23  ;;  %s216_s28 = scalar_lea.vmem (!%p207_p3), [#allocation2], %s545_s25 }
  0x37   : > { %709 = dma.done.wait (%p814_p6), %s213_s26, 512  }
  0x38   : > { %711 = vsyncadd (%p814_p6), %s213_s26, 4294966784  ;;  %v885_v0 = vld [vmem:[%s216_s28] sm:$0xff]  ;;  %v887_v1 = vld [vmem:[%s216_s28 + $0x8] sm:$0xff]  ;;  %v735_v9 = vmov 0.0|0.0   ;;  %vm736_vm0 = vmmov 0   ;;  %v737_v10 = vmov 0.0   ;;  %v260_v11 = vlaneseq }
  0x39   : > { %v889_v2 = vld [vmem:[%s216_s28 + $0x10] sm:$0xff]  ;;  %v247_v3 = vadd.f32 %v887_v1, %v885_v0  ;;  %v893_v4 = vld [vmem:[%s216_s28 + $0x18] sm:$0xff]  ;;  %v255_v6 = vld [vmem:[%s969_s1] sm:$0xff]  ;;  %574 = vmatprep.subr.bf16.mxu0 %v735_v9  ;;  %566 = vmatprep.mubr.msk.f32.mxu0 %vm736_vm0, %v737_v10  ;;  %vm271_vm1 = vcmask 130112   ;;  %vm273_vm2 = vcmask 130048   ;;  %vm353_vm3 = vcmask 1041408  }
  0x3a   : > { %v250_v5 = vadd.f32 %v893_v4, %v889_v2  ;;  %v256_v7 = vld [vmem:[%s969_s1 + $0x8] sm:$0xff]  ;;  %569 = vmatprep.subr.mxu1 %v737_v10  ;;  %571 = vmatprep.mubr.msk.f32.mxu1 %vm736_vm0, %v737_v10  ;;  %v261_v12 = vand.u32 127, %v260_v11  ;;  %v263_v13 = vshrl.u32 %v260_v11, 7  ;;  %v347_v24 = vld [vmem:[%s971_s3] sm:$0x3]  ;;  %vm349_vm4 = vcmask 15360  }
  0x3b   : > { %248 = vadd.xlane.f32.xlu0 %v247_v3  ;;  %v575_v8 = vpack.c.bf16 %v256_v7, %v255_v6  ;;  %570 = vmatpush3.msk.msra.mxu1 %vm353_vm3, %v347_v24  ;;  %v257_v25 = vld [vmem:[%s970_s2] sm:$0x1]  ;;  %s242_s13 = scalar_lea.vmem [#allocation5], %s545_s25  ;;  %s556_s26 = sshll.u32 %s792_s22, 9 }
  0x3c   : > { %v266_v14 = vadd.s32 4294967288, %v261_v12  ;;  %v264_v16 = vsub.s32 %v261_v12, %v263_v13  ;;  %v348_v30 = vld [vmem:[%s972_s4] sm:$0x1]  ;;  %v434_v38 = vsub.s32 0, %v263_v13  ;;  %s465_s17 = sshll.u32 %s242_s13, 4  ;;  %s922_s25 = scalar_lea.hbm %s973_s5, %s556_s26  ;;  %s917_s17 = int_to_ptr.vmem [resolvable:$true] %s465_s17 }
  0x3d   : > { %576 = vmatpush3.bf16.msra.mxu0 %v575_v8  ;;  %s452_s22 = scalar_lea.sflag [#allocation4], %s875_s23  ;;  %s664_s14 = scalar_lea.vmem %s917_s17, 512 }
  0x3e   : > { %v269_v18 = vsub.s32 %v266_v14, %v263_v13  ;;  %p665_p6 = scmp.ne.s32.totalorder %s917_s17, %s664_s14  ;;  %p980_p11 = scmp.ne.s32.totalorder %s977_s30, 0 }
  0x3f   : > { %251 = vadd.xlane.f32.xlu0 %v250_v5  ;;  %s738_s29 = smov [#allocation5]  }
  0x40   : > { %p666_p12 = pnand %p665_p6, %p980_p11  ;;  %s668_s15 = sshll.u32 %s738_s29, 4  ;;  %s669_s15 = int_to_ptr.vmem [resolvable:$false] %s668_s15 }
  0x41   : > { %s670_s16 = scalar_lea.vmem %s669_s15, 1024  ;;  %p671_p8 = scmp.lt.s32.totalorder %s917_s17, %s669_s15 }
  0x42   : > { %p667_p13 = pneg %p666_p12  ;;  %p672_p10 = scmp.lt.s32.totalorder %s670_s16, %s664_s14 }
  0x44   : > { %p673_p0 = por %p672_p10, %p671_p8 }
  0x46   : > { %p674_p2 = pnand %p673_p0, %p667_p13 }
  0xc8   : > { %v249_v15 = vpop.xlane.xlu0 %248 }
  0xc9   : > { %v253_v17 = vmul.f32 0.00390625, %v249_v15 }
  0xcb   : > { %v265_v21 = vrot.slane %v253_v17, %v264_v16 }
  0xcc   : > { %v252_v19 = vpop.xlane.xlu0 %251 }
  0xcd   : > { %v254_v20 = vmul.f32 0.00390625, %v252_v19 }
  0xcf   : > { %v270_v22 = vrot.slane %v254_v20, %v269_v18 }
  0xd1   : > { %v272_v23 = vsel %vm271_vm1, %v270_v22, %v265_v21 }
  0xd2   : > { %567 = vmatmul.mubr.msk.f32.vlgmr.msra.gmra.mrb[0].mxu0 %vm273_vm2, %v272_v23 }
 0x1a5   : > { %v342_v26 = vpop.f32.mrb[0].mxu0 }
 0x1a6   : > { %v343_v27 = vadd.f32 %v342_v26, %v257_v25  ;;  %v568_v28 = vpop.f32.mrb[1].mxu0 }
 0x1a8   : > { %v346_v29 = vmax.f32 %v343_v27, 0.0 }
 0x1aa   : > { %572 = vmatmul.mubr.msk.f32.vlgmr.msra.gmra.mrb[0].mxu1 %vm349_vm4, %v346_v29 }
 0x27d   : > { %v423_v31 = vpop.f32.mrb[0].mxu1 }
 0x27e   : > { %v424_v32 = vadd.f32 %v423_v31, %v348_v30  ;;  %v573_v33 = vpop.f32.mrb[1].mxu1 }
 0x280   : > { %v427_v34 = vsub.f32 0.0, %v424_v32 }
 0x282   : > { %v428_v35 = vmul.f32 1.442695, %v427_v34 }
 0x284   : > { %630 = vpow2.f32 %v428_v35 }
 0x28e   : > { %v631_v36 = vpop.eup %630 }
 0x28f   : > { %v430_v37 = vadd.f32 1.0, %v631_v36 }
 0x291   : > { %632 = vrcp.f32 %v430_v37 }
 0x29b   : > { %v633_v39 = vpop.eup %632 }
 0x29c   : > { %v435_v40 = vrot.slane %v633_v39, %v434_v38 }
 0x29e   : > { %437 = vbcast.lane.b32.xlu1 %v435_v40, 256 }
 0x2a2   : > { %441 = vbcast.lane.b32.xlu1 %v435_v40, 264 }
 0x310   : > { %v438_v41 = vpop.permute.xlu1 %437 }
 0x311   : > { %v443_v42 = vmul.f32 %v438_v41, %v885_v0  ;;  %v444_v43 = vmul.f32 %v438_v41, %v887_v1 }
 0x313   : > { %447 = vst [vmem:[%s242_s13] sm:$0xff] %v443_v42  ;;  %448 = vst [vmem:[%s242_s13 + $0x8] sm:$0xff] %v444_v43 }
 0x314   : > { %v442_v44 = vpop.permute.xlu1 %441 }
 0x315   : > { %v445_v45 = vmul.f32 %v442_v44, %v889_v2  ;;  %v446_v46 = vmul.f32 %v442_v44, %v893_v4 }
 0x317   : > { %449 = vst [vmem:[%s242_s13 + $0x10] sm:$0xff] %v445_v45  ;;  %450 = vst [vmem:[%s242_s13 + $0x18] sm:$0xff] %v446_v46 }
 0x318   : > { %677 = shalt.err (!%p674_p2)
}
 0x319   : > { %s678_s8 = scalar_lea.hbm %s922_s25, 512  ;;  %s682_s10 = scalar_lea.hbm %s973_s5, 1024 }
 0x31a   : > { %p679_p4 = scmp.ne.s32.totalorder %s922_s25, %s678_s8  ;;  %p683_p9 = scmp.lt.u32.totalorder %s922_s25, %s973_s5 }
 0x31b   : > { %p684_p1 = scmp.lt.u32.totalorder %s682_s10, %s678_s8  ;;  %p686_p6 = scmp.lt.u32.totalorder %s678_s8, %s922_s25 }
 0x31c   : > { %p680_p5 = pnand %p679_p4, %p980_p11 }
 0x31d   : > { %p685_p3 = por %p684_p1, %p683_p9 }
 0x31e   : > { %p681_p7 = pneg %p680_p5 }
 0x31f   : > { %p687_p12 = por %p686_p6, %p685_p3 }
 0x321   : > { %p688_p13 = pnand %p687_p12, %p681_p7 }
 0x323   : > { %691 = shalt.err (!%p688_p13)
}
 0x324   : > { %s739_s26 = smov 256   ;;  %s740_s28 = smov 16  }
 0x325   : > { %579 = dma.vmem_to_hbm [thread:$0]  (%p980_p11), %s917_s17, 512, %s922_s25, %s452_s22, %s739_s26, %s739_s26, %s740_s28  }
 0x326 PF: > { %s480_s12 = sand.u32 1, %s718_s18   ;;  %p981_p8 = scmp.ne.s32.totalorder %s978_s6, 0 }
 0x327   : > { %p982_p10 = scmp.ge.s32.totalorder %s730_s21, 2  ;;  %s481_s14 = scalar_lea.sflag [#allocation4], %s480_s12 }
 0x329   : > { %p586_p0 = pnand %p982_p10, %p981_p8 }
 0x32b   : > { %713 = dma.done.wait (!%p586_p0), %s481_s14, 512  }
 0x32c   : > { %715 = vsyncadd (!%p586_p0), %s481_s14, 4294966784  ;;  %p18_p2 = scmp.ge.s32.totalorder %s796_s24, 4   ;;  %s983_s18 = smov %s722_s19 }
 0x32d   : > { %s984_s19 = smov %s726_s20  ;;  %s985_s20 = smov %s808_s27 }
 0x32e   : > { %s986_s21 = smov %s796_s24  ;;  %20 = sbr.rel (!%p18_p2) target bundleno = 5 (0x5), region = 85 }
 0x335   :  { %486 = vsyncpa [#allocation3], 1 }
 0x336   :  { %488 = vsyncpa [#allocation3 + $0x1], 1 }
 0x337   :  { %489 = vsyncpa [#allocation4], 1 }
 0x338   :  { %491 = vsyncpa [#allocation4 + $0x1], 1 }

</bundles_post_ra>
